<compile_context>
chip_gen: v5e
topology: v5e:2x2
jax: 0.10.0
libtpu: 0.0.40
codegen_flags: <defaults>
</compile_context>

<pallas_src>
import functools

import jax
import jax.numpy as jnp
from jax.experimental import pallas as pl
from jax.experimental.pallas import tpu as pltpu

LN_EPS = 1e-5  # PyTorch nn.LayerNorm default


def _round_up(a: int, b: int) -> int:
    return (a + b - 1) // b * b


@functools.lru_cache(maxsize=None)
def _tpu_config():
    """(per-core VMEM capacity bytes, default row block) for the local TPU generation."""
    vmem_cap = 64 * 1024 * 1024            # conservative fallback = v7x per-TC VMEM
    try:
        vmem_cap = int(pltpu.get_tpu_info().vmem_capacity_bytes)
    except Exception:
        pass
    block_m = 256                          # v6e/v7x: 256-wide MXU
    try:
        kind = jax.devices()[0].device_kind.lower()
        if "v5e" in kind or "v5 lite" in kind or "v5lite" in kind:
            block_m = 128                  # v5e: 4x128x128 MXU, 16 MiB scoped-VMEM default
    except Exception:
        pass
    return vmem_cap, block_m


def _s6_kernel(x_ref, gamma_ref, beta_ref, w1_ref, b1_ref, w2_ref, b2_ref, o_ref,
               xn_ref, acc_ref, *, hidden_dim: int):
    """One (row block i, 4H block k) grid step.

    x_ref: [bm, Hp]    w1_ref: [Hp, tk]    w2_ref: [tk, Hp]
    xn_ref: [bm, Hp] cached normalized input (MXU operand dtype)
    acc_ref: [bm, Hp] f32 output accumulator
    """
    k = pl.program_id(1)

    # ---- k == 0: LayerNorm once per row block; cache xn, zero the accumulator ----
    @pl.when(k == 0)
    def _():
        xf = x_ref[...].astype(jnp.float32)
        inv_h = 1.0 / hidden_dim
        # Padded columns of x are zero, so sum(x) and sum(x*x) over Hp are exact
        # over the true hidden_dim -> no column mask (iota/compare/select) needed.
        mean = jnp.sum(xf, axis=-1, keepdims=True) * inv_h
        var = jnp.sum(xf * xf, axis=-1, keepdims=True) * inv_h - mean * mean
        inv = jax.lax.rsqrt(jnp.maximum(var, 0.0) + LN_EPS)
        # Padded gamma/beta columns are zero -> padded columns of xn are zero.
        xn = (xf - mean) * inv * gamma_ref[...].astype(jnp.float32) \
            + beta_ref[...].astype(jnp.float32)
        xn_ref[...] = xn.astype(xn_ref.dtype)
        acc_ref[...] = jnp.zeros_like(acc_ref)

    # ---- Linear1 chunk (H -> tk columns of 4H): native-dtype MXU, f32 accumulate ----
    h = jnp.dot(xn_ref[...], w1_ref[...], preferred_element_type=jnp.float32)
    h = h + b1_ref[...].astype(jnp.float32)
    # Exact (erf) GELU, matching torch.nn.GELU() default.
    # TODO(synk): tanh-approx GELU would offload to the EUP (biggest win on v5e) but
    # changes numerics vs torch's exact default, so it is not enabled here.
    h = 0.5 * h * (1.0 + jax.lax.erf(h * 0.7071067811865476))
    # TODO(synk): dropout is identity (eval mode); training-mode dropout would use
    # pltpu.prng_seed / pltpu.stateful_bernoulli.

    # ---- Linear2 chunk (tk rows of 4H -> H), accumulated across k ----
    acc_ref[...] += jnp.dot(h.astype(w2_ref.dtype), w2_ref[...],
                            preferred_element_type=jnp.float32)

    # ---- k == last: bias2 + residual, single lane-dense store ----
    @pl.when(k == pl.num_programs(1) - 1)
    def _():
        y = acc_ref[...] + b2_ref[...].astype(jnp.float32) \
            + x_ref[...].astype(jnp.float32)
        o_ref[...] = y.astype(o_ref.dtype)


@functools.partial(jax.jit, static_argnames=("block_m", "k_tile"))
def s6_layer(x, gamma, beta, w1, b1, w2, b2, *, block_m: int | None = None,
             k_tile: int | None = None):
    """x: [..., H] -> [..., H].  W1: [H, 4H], W2: [4H, H]  (kernel computes x @ W)."""
    orig_shape = x.shape
    H = orig_shape[-1]
    H4 = 4 * H
    x2d = x.reshape(-1, H)
    N = x2d.shape[0]

    vmem_cap, bm_default = _tpu_config()
    if block_m is None:
        block_m = bm_default

    x_bytes = x.dtype.itemsize
    w_bytes = w1.dtype.itemsize

    # Lane-dense hidden dims (multiples of 128).
    Hp = _round_up(H, 128)
    H4p = _round_up(H4, 128)

    # Row tile: multiple of the dtype sublane packing (f32: 8, bf16: 16, int8/fp8: 32);
    # keep >= 2 grid steps when possible so both v7x TensorCores get work.
    sub = max(8, 32 // min(x_bytes, w_bytes))
    block_m = _round_up(block_m, sub)
    if N >= 2 * block_m:
        bm = block_m
    else:
        bm = min(block_m, _round_up((N + 1) // 2, sub))
    Np = _round_up(N, bm)

    # ---- 4H-axis (K) tiling: weight residency O(Hp * tk) instead of O(Hp * H4p) ----
    # tk-dependent VMEM: W1 (Hp,tk) + W2 (tk,Hp) + b1, double-buffered, plus the f32
    # h tile and its matmul-2 cast.  tk-independent: x/out tiles (double-buffered),
    # xn/acc scratch, LN/epilogue f32 temporaries, small vectors.
    per_tk = 2 * (2 * Hp + 1) * w_bytes + bm * (4 + w_bytes)
    const = (4 * bm * Hp * x_bytes            # x + out tiles, double-buffered
             + bm * Hp * (4 + w_bytes)        # acc (f32) + cached xn scratch
             + 3 * bm * Hp * 4                # LN / epilogue f32 temporaries
             + 8 * Hp * 4)                    # gamma/beta/b2 (generous)
    budget = vmem_cap // 2                    # leave headroom for the compiler
    if k_tile is None:
        k_tile = 128
        m = H4p // 128
        for d in range(m, 0, -1):             # largest lane-aligned divisor that fits
            if m % d == 0 and const + 128 * d * per_tk <= budget:
                k_tile = 128 * d
                break
        # TODO(synk): for extreme H where even tk=128 misses the budget, also tile
        # the Hp axis (extra accumulator dimension) instead of relying on spills.
    tk = min(_round_up(k_tile, 128), H4p)
    H4p = _round_up(H4p, tk)                  # keep the k grid even
    grid = (Np // bm, H4p // tk)

    # Pad only when needed (skip the HBM pad/slice round trip when already aligned).
    xp = x2d if (Np == N and Hp == H) else jnp.pad(x2d, ((0, Np - N), (0, Hp - H)))

    def _pad_vec(v, n):
        v2 = v if v.shape[0] == n else jnp.pad(v, (0, n - v.shape[0]))
        return v2.reshape(1, n)

    gamma_p = _pad_vec(gamma, Hp)
    beta_p = _pad_vec(beta, Hp)
    b1_p = _pad_vec(b1, H4p)
    b2_p = _pad_vec(b2, Hp)
    w1_p = w1 if (Hp == H and H4p == H4) else jnp.pad(w1, ((0, Hp - H), (0, H4p - H4)))
    w2_p = w2 if (Hp == H and H4p == H4) else jnp.pad(w2, ((0, H4p - H4), (0, Hp - H)))

    # Cost hint for XLA's scheduler.  Weights are re-streamed per row block only
    # when the K axis is actually tiled (num_k > 1).
    num_m, num_k = grid
    w_refetch = num_m if num_k > 1 else 1
    cost = pl.CostEstimate(
        flops=int(4 * Np * Hp * H4p),                     # two matmuls (2 flops/MAC)
        transcendentals=int(Np * H4p),                    # erf per GELU element
        bytes_accessed=int(2 * Np * Hp * x_bytes
                           + w_refetch * (2 * Hp * H4p + H4p + 3 * Hp) * w_bytes),
    )

    # Generation-aware scoped-VMEM limit: include in-body temporaries, never exceed
    # physical VMEM (64 MiB per TensorCore on v7x) minus headroom.
    vmem_est = const + tk * per_tk
    cp_kwargs = dict(dimension_semantics=("parallel", "arbitrary"))
    if vmem_est > 12 * 1024 * 1024:           # above the most conservative (v5e) default
        cp_kwargs["vmem_limit_bytes"] = int(
            min(vmem_cap - 8 * 1024 * 1024,
                max(vmem_est * 3 // 2, 32 * 1024 * 1024)))

    out = pl.pallas_call(
        functools.partial(_s6_kernel, hidden_dim=H),
        out_shape=jax.ShapeDtypeStruct((Np, Hp), x.dtype),
        grid_spec=pltpu.PrefetchScalarGridSpec(
            num_scalar_prefetch=0,
            grid=grid,
            in_specs=[
                pl.BlockSpec((bm, Hp), lambda i, k: (i, 0)),    # x rows (resident over k)
                pl.BlockSpec((1, Hp), lambda i, k: (0, 0)),     # gamma
                pl.BlockSpec((1, Hp), lambda i, k: (0, 0)),     # beta
                pl.BlockSpec((Hp, tk), lambda i, k: (0, k)),    # W1 column block
                pl.BlockSpec((1, tk), lambda i, k: (0, k)),     # b1 block
                pl.BlockSpec((tk, Hp), lambda i, k: (k, 0)),    # W2 row block
                pl.BlockSpec((1, Hp), lambda i, k: (0, 0)),     # b2
            ],
            out_specs=pl.BlockSpec((bm, Hp), lambda i, k: (i, 0)),
            scratch_shapes=[
                pltpu.VMEM((bm, Hp), w1.dtype),      # cached xn (MXU operand dtype)
                pltpu.VMEM((bm, Hp), jnp.float32),   # y accumulator
            ],
        ),
        compiler_params=pltpu.CompilerParams(**cp_kwargs),
        cost_estimate=cost,
    )(xp, gamma_p, beta_p, w1_p, b1_p, w2_p, b2_p)

    if Np != N or Hp != H:
        out = out[:N, :H]
    return out.reshape(orig_shape)


def init_params(key, hidden_dim):
    """Deterministic synthetic parameters matching the PyTorch module shapes."""
    k1, k2, k3, k4 = jax.random.split(key, 4)
    H = hidden_dim
    gamma = jnp.ones((H,), jnp.float32)              # LayerNorm weight
    beta = jnp.zeros((H,), jnp.float32)              # LayerNorm bias
    # Linear weights stored as (in, out) so the kernel does x @ W
    w1 = jax.random.normal(k1, (H, 4 * H), jnp.float32) * (1.0 / jnp.sqrt(H))
    b1 = jax.random.normal(k2, (4 * H,), jnp.float32) * 0.02
    w2 = jax.random.normal(k3, (4 * H, H), jnp.float32) * (1.0 / jnp.sqrt(4 * H))
    b2 = jax.random.normal(k4, (H,), jnp.float32) * 0.02
    return gamma, beta, w1, b1, w2, b2


def _reference(x, gamma, beta, w1, b1, w2, b2):
    mean = jnp.mean(x, axis=-1, keepdims=True)
    var = jnp.mean((x - mean) ** 2, axis=-1, keepdims=True)
    xn = (x - mean) / jnp.sqrt(var + LN_EPS) * gamma + beta
    h = xn @ w1 + b1
    h = jax.nn.gelu(h, approximate=False)
    y = h @ w2 + b2
    return y + x


if __name__ == "__main__":
    key = jax.random.PRNGKey(0)
    k_x, k_p = jax.random.split(key)

    batch, seq, hidden = 2, 8, 32
    x = jax.random.normal(k_x, (batch, seq, hidden), jnp.float32)
    params = init_params(k_p, hidden)

    # f32 path: must match the exact-math reference tightly.
    out = jax.block_until_ready(s6_layer(x, *params))
    ref = _reference(x, *params)
    assert out.shape == x.shape
    assert jnp.allclose(out, ref, atol=1e-4, rtol=1e-4), "f32 mismatch vs reference"

    # bf16 fast path: native-dtype MXU operands with f32 accumulation (loose tolerance).
    x_bf16 = x.astype(jnp.bfloat16)
    params_bf16 = tuple(p.astype(jnp.bfloat16) for p in params)
    out_bf16 = jax.block_until_ready(s6_layer(x_bf16, *params_bf16))
    assert out_bf16.shape == x.shape and out_bf16.dtype == jnp.bfloat16
    assert jnp.allclose(out_bf16.astype(jnp.float32), ref, atol=2e-1, rtol=1e-1), \
        "bf16 mismatch vs reference"

    # Exercise the K-tiled accumulation path (multiple 4H blocks) and non-128 hidden dim.
    hidden2 = 96
    x2 = jax.random.normal(k_x, (batch, seq, hidden2), jnp.float32)
    params2 = init_params(k_p, hidden2)
    out2 = jax.block_until_ready(s6_layer(x2, *params2, k_tile=128))
    ref2 = _reference(x2, *params2)
    assert jnp.allclose(out2, ref2, atol=1e-4, rtol=1e-4), "k-tiled mismatch vs reference"

    print("KERNEL_OK")
</pallas_src>

<mosaic_0001>
module attributes {stable_mosaic.version = 11 : i64} {
  func.func @_s6_kernel(%arg0: i32, %arg1: i32, %arg2: memref<8x128xf32, #tpu.memory_space<vmem>>, %arg3: memref<1x128xf32, #tpu.memory_space<vmem>>, %arg4: memref<1x128xf32, #tpu.memory_space<vmem>>, %arg5: memref<128x128xf32, #tpu.memory_space<vmem>>, %arg6: memref<1x128xf32, #tpu.memory_space<vmem>>, %arg7: memref<128x128xf32, #tpu.memory_space<vmem>>, %arg8: memref<1x128xf32, #tpu.memory_space<vmem>>, %arg9: memref<8x128xf32, #tpu.memory_space<vmem>>, %arg10: memref<8x128xf32, #tpu.memory_space<vmem>>, %arg11: memref<8x128xf32, #tpu.memory_space<vmem>>) attributes {dimension_semantics = [#tpu.dimension_semantics<parallel>, #tpu.dimension_semantics<arbitrary>], iteration_bounds = array<i64: 2, 1>, scalar_prefetch = 0 : i64, scratch_operands = 2 : i64, tpu.core_type = #tpu.core_type<tc>, window_params = [{transform_indices = @transform_0, window_bounds = array<i64: 8, 128>}, {pipeline_mode = #tpu.pipeline_mode<synchronous>, transform_indices = @transform_1, window_bounds = array<i64: 1, 128>}, {pipeline_mode = #tpu.pipeline_mode<synchronous>, transform_indices = @transform_2, window_bounds = array<i64: 1, 128>}, {transform_indices = @transform_3, window_bounds = array<i64: 128, 128>}, {transform_indices = @transform_4, window_bounds = array<i64: 1, 128>}, {transform_indices = @transform_5, window_bounds = array<i64: 128, 128>}, {pipeline_mode = #tpu.pipeline_mode<synchronous>, transform_indices = @transform_6, window_bounds = array<i64: 1, 128>}, {transform_indices = @transform_7, window_bounds = array<i64: 8, 128>}]} {
    %c0_i32 = arith.constant 0 : i32
    %0 = arith.cmpi eq, %arg1, %c0_i32 : i32
    %1 = arith.extui %0 : i1 to i32
    %c0_i32_0 = arith.constant 0 : i32
    %2 = arith.cmpi ne, %1, %c0_i32_0 : i32
    scf.if %2 {
      %c0_18 = arith.constant 0 : index
      %c0_19 = arith.constant 0 : index
      %25 = vector.load %arg2[%c0_18, %c0_19] : memref<8x128xf32, #tpu.memory_space<vmem>>, vector<8x128xf32>
      %cst_20 = arith.constant dense<0.000000e+00> : vector<8xf32>
      %26 = vector.multi_reduction <add>, %25, %cst_20 [1] : vector<8x128xf32> to vector<8xf32>
      %27 = vector.shape_cast %26 : vector<8xf32> to vector<8x1xf32>
      %cst_21 = arith.constant 3.125000e-02 : f32
      %28 = vector.broadcast %cst_21 : f32 to vector<8x1xf32>
      %29 = arith.mulf %27, %28 : vector<8x1xf32>
      %30 = arith.mulf %25, %25 : vector<8x128xf32>
      %cst_22 = arith.constant dense<0.000000e+00> : vector<8xf32>
      %31 = vector.multi_reduction <add>, %30, %cst_22 [1] : vector<8x128xf32> to vector<8xf32>
      %32 = vector.shape_cast %31 : vector<8xf32> to vector<8x1xf32>
      %cst_23 = arith.constant 3.125000e-02 : f32
      %33 = vector.broadcast %cst_23 : f32 to vector<8x1xf32>
      %34 = arith.mulf %32, %33 : vector<8x1xf32>
      %35 = arith.mulf %29, %29 : vector<8x1xf32>
      %36 = arith.subf %34, %35 : vector<8x1xf32>
      %cst_24 = arith.constant 0.000000e+00 : f32
      %37 = vector.broadcast %cst_24 : f32 to vector<8x1xf32>
      %38 = arith.maximumf %36, %37 : vector<8x1xf32>
      %cst_25 = arith.constant 9.99999974E-6 : f32
      %39 = vector.broadcast %cst_25 : f32 to vector<8x1xf32>
      %40 = arith.addf %38, %39 : vector<8x1xf32>
      %41 = math.rsqrt %40 : vector<8x1xf32>
      %42 = vector.broadcast %29 : vector<8x1xf32> to vector<8x128xf32>
      %43 = arith.subf %25, %42 : vector<8x128xf32>
      %44 = vector.broadcast %41 : vector<8x1xf32> to vector<8x128xf32>
      %45 = arith.mulf %43, %44 : vector<8x128xf32>
      %c0_26 = arith.constant 0 : index
      %c0_27 = arith.constant 0 : index
      %46 = vector.load %arg3[%c0_26, %c0_27] : memref<1x128xf32, #tpu.memory_space<vmem>>, vector<1x128xf32>
      %47 = vector.broadcast %46 : vector<1x128xf32> to vector<8x128xf32>
      %48 = arith.mulf %45, %47 : vector<8x128xf32>
      %c0_28 = arith.constant 0 : index
      %c0_29 = arith.constant 0 : index
      %49 = vector.load %arg4[%c0_28, %c0_29] : memref<1x128xf32, #tpu.memory_space<vmem>>, vector<1x128xf32>
      %50 = vector.broadcast %49 : vector<1x128xf32> to vector<8x128xf32>
      %51 = arith.addf %48, %50 : vector<8x128xf32>
      %c0_30 = arith.constant 0 : index
      %c0_31 = arith.constant 0 : index
      %52 = vector.load %arg10[%c0_30, %c0_31] : memref<8x128xf32, #tpu.memory_space<vmem>>, vector<8x128xf32>
      tpu.vector_store %arg10[%c0_30, %c0_31], %51 {strides = array<i32>} : memref<8x128xf32, #tpu.memory_space<vmem>>, vector<8x128xf32>,
      %cst_32 = arith.constant 0.000000e+00 : f32
      %53 = vector.broadcast %cst_32 : f32 to vector<8x128xf32>
      %c0_33 = arith.constant 0 : index
      %c0_34 = arith.constant 0 : index
      %54 = vector.load %arg11[%c0_33, %c0_34] : memref<8x128xf32, #tpu.memory_space<vmem>>, vector<8x128xf32>
      tpu.vector_store %arg11[%c0_33, %c0_34], %53 {strides = array<i32>} : memref<8x128xf32, #tpu.memory_space<vmem>>, vector<8x128xf32>,
    } else {
    }
    %c0 = arith.constant 0 : index
    %c0_1 = arith.constant 0 : index
    %3 = vector.load %arg10[%c0, %c0_1] : memref<8x128xf32, #tpu.memory_space<vmem>>, vector<8x128xf32>
    %c0_2 = arith.constant 0 : index
    %c0_3 = arith.constant 0 : index
    %4 = vector.load %arg5[%c0_2, %c0_3] : memref<128x128xf32, #tpu.memory_space<vmem>>, vector<128x128xf32>
    %cst = arith.constant dense<0.000000e+00> : vector<8x128xf32>
    %5 = tpu.matmul %3, %4, %cst {dimension_numbers = #tpu.dot_dimension_numbers<[1], [0], [0], [1], [0, 0, 1, 1], [], []>} : vector<8x128xf32>, vector<128x128xf32>, vector<8x128xf32> -> vector<8x128xf32>
    %c0_4 = arith.constant 0 : index
    %c0_5 = arith.constant 0 : index
    %6 = vector.load %arg6[%c0_4, %c0_5] : memref<1x128xf32, #tpu.memory_space<vmem>>, vector<1x128xf32>
    %7 = vector.broadcast %6 : vector<1x128xf32> to vector<8x128xf32>
    %8 = arith.addf %5, %7 : vector<8x128xf32>
    %cst_6 = arith.constant 5.000000e-01 : f32
    %9 = vector.broadcast %cst_6 : f32 to vector<8x128xf32>
    %10 = arith.mulf %9, %8 : vector<8x128xf32>
    %cst_7 = arith.constant 0.707106769 : f32
    %11 = vector.broadcast %cst_7 : f32 to vector<8x128xf32>
    %12 = arith.mulf %8, %11 : vector<8x128xf32>
    %13 = math.erf %12 : vector<8x128xf32>
    %cst_8 = arith.constant 1.000000e+00 : f32
    %14 = vector.broadcast %cst_8 : f32 to vector<8x128xf32>
    %15 = arith.addf %14, %13 : vector<8x128xf32>
    %16 = arith.mulf %10, %15 : vector<8x128xf32>
    %c0_9 = arith.constant 0 : index
    %c0_10 = arith.constant 0 : index
    %17 = vector.load %arg11[%c0_9, %c0_10] : memref<8x128xf32, #tpu.memory_space<vmem>>, vector<8x128xf32>
    %c0_11 = arith.constant 0 : index
    %c0_12 = arith.constant 0 : index
    %18 = vector.load %arg7[%c0_11, %c0_12] : memref<128x128xf32, #tpu.memory_space<vmem>>, vector<128x128xf32>
    %cst_13 = arith.constant dense<0.000000e+00> : vector<8x128xf32>
    %19 = tpu.matmul %16, %18, %cst_13 {dimension_numbers = #tpu.dot_dimension_numbers<[1], [0], [0], [1], [0, 0, 1, 1], [], []>} : vector<8x128xf32>, vector<128x128xf32>, vector<8x128xf32> -> vector<8x128xf32>
    %20 = arith.addf %17, %19 : vector<8x128xf32>
    %c0_14 = arith.constant 0 : index
    %c0_15 = arith.constant 0 : index
    %21 = vector.load %arg11[%c0_14, %c0_15] : memref<8x128xf32, #tpu.memory_space<vmem>>, vector<8x128xf32>
    tpu.vector_store %arg11[%c0_14, %c0_15], %20 {strides = array<i32>} : memref<8x128xf32, #tpu.memory_space<vmem>>, vector<8x128xf32>,
    %c0_i32_16 = arith.constant 0 : i32
    %22 = arith.cmpi eq, %arg1, %c0_i32_16 : i32
    %23 = arith.extui %22 : i1 to i32
    %c0_i32_17 = arith.constant 0 : i32
    %24 = arith.cmpi ne, %23, %c0_i32_17 : i32
    scf.if %24 {
      %c0_18 = arith.constant 0 : index
      %c0_19 = arith.constant 0 : index
      %25 = vector.load %arg11[%c0_18, %c0_19] : memref<8x128xf32, #tpu.memory_space<vmem>>, vector<8x128xf32>
      %c0_20 = arith.constant 0 : index
      %c0_21 = arith.constant 0 : index
      %26 = vector.load %arg8[%c0_20, %c0_21] : memref<1x128xf32, #tpu.memory_space<vmem>>, vector<1x128xf32>
      %27 = vector.broadcast %26 : vector<1x128xf32> to vector<8x128xf32>
      %28 = arith.addf %25, %27 : vector<8x128xf32>
      %c0_22 = arith.constant 0 : index
      %c0_23 = arith.constant 0 : index
      %29 = vector.load %arg2[%c0_22, %c0_23] : memref<8x128xf32, #tpu.memory_space<vmem>>, vector<8x128xf32>
      %30 = arith.addf %28, %29 : vector<8x128xf32>
      %c0_24 = arith.constant 0 : index
      %c0_25 = arith.constant 0 : index
      %31 = vector.load %arg9[%c0_24, %c0_25] : memref<8x128xf32, #tpu.memory_space<vmem>>, vector<8x128xf32>
      tpu.vector_store %arg9[%c0_24, %c0_25], %30 {strides = array<i32>} : memref<8x128xf32, #tpu.memory_space<vmem>>, vector<8x128xf32>,
    } else {
    }
    return
  }
  func.func @transform_0(%arg0: i32, %arg1: i32) -> (i32, i32) {
    %c0_i32 = arith.constant 0 : i32
    %c0_i32_0 = arith.constant 0 : i32
    return %arg0, %c0_i32 : i32, i32
  }
  func.func @transform_1(%arg0: i32, %arg1: i32) -> (i32, i32) {
    %c0_i32 = arith.constant 0 : i32
    %c0_i32_0 = arith.constant 0 : i32
    %c0_i32_1 = arith.constant 0 : i32
    return %c0_i32, %c0_i32_0 : i32, i32
  }
  func.func @transform_2(%arg0: i32, %arg1: i32) -> (i32, i32) {
    %c0_i32 = arith.constant 0 : i32
    %c0_i32_0 = arith.constant 0 : i32
    %c0_i32_1 = arith.constant 0 : i32
    return %c0_i32, %c0_i32_0 : i32, i32
  }
  func.func @transform_3(%arg0: i32, %arg1: i32) -> (i32, i32) {
    %c0_i32 = arith.constant 0 : i32
    %c0_i32_0 = arith.constant 0 : i32
    return %c0_i32, %arg1 : i32, i32
  }
  func.func @transform_4(%arg0: i32, %arg1: i32) -> (i32, i32) {
    %c0_i32 = arith.constant 0 : i32
    %c0_i32_0 = arith.constant 0 : i32
    return %c0_i32, %arg1 : i32, i32
  }
  func.func @transform_5(%arg0: i32, %arg1: i32) -> (i32, i32) {
    %c0_i32 = arith.constant 0 : i32
    %c0_i32_0 = arith.constant 0 : i32
    return %arg1, %c0_i32 : i32, i32
  }
  func.func @transform_6(%arg0: i32, %arg1: i32) -> (i32, i32) {
    %c0_i32 = arith.constant 0 : i32
    %c0_i32_0 = arith.constant 0 : i32
    %c0_i32_1 = arith.constant 0 : i32
    return %c0_i32, %c0_i32_0 : i32, i32
  }
  func.func @transform_7(%arg0: i32, %arg1: i32) -> (i32, i32) {
    %c0_i32 = arith.constant 0 : i32
    %c0_i32_0 = arith.constant 0 : i32
    return %arg0, %c0_i32 : i32, i32
  }
}

</mosaic_0001>

<bundles_post_ra>
// kernel: s6_layer.1
= control target key start
LH: loop header
LB: loop body
LE: loop exit
PB: predicated region body
PF: predicated region fallthrough
CT: control target
= control target key end

     0   :  { %s728_s24 = smov 0   ;;  %s730_s25 = smov 0   ;;  %s883_s0 = inlined_call_operand.vmem [shape: f32[16,128], index: 0, kind: input, shape index: {}]   ;;  %s884_s1 = inlined_call_operand.vmem [shape: f32[1,128], index: 1, kind: input, shape index: {}]   ;;  %s885_s2 = inlined_call_operand.vmem [shape: f32[1,128], index: 2, kind: input, shape index: {}]   ;;  %s886_s3 = inlined_call_operand.vmem [shape: f32[128,128], index: 3, kind: input, shape index: {}]   ;;  %s887_s4 = inlined_call_operand.vmem [shape: f32[1,128], index: 4, kind: input, shape index: {}]   ;;  %s888_s5 = inlined_call_operand.vmem [shape: f32[128,128], index: 5, kind: input, shape index: {}]   ;;  %s889_s6 = inlined_call_operand.vmem [shape: f32[1,128], index: 6, kind: input, shape index: {}]   ;;  %s890_s7 = inlined_call_operand.vmem [shape: f32[16,128], index: 7, kind: output, shape index: {}]  }
   0x1   :  { %s732_s26 = smov 0  }
   0x2 LB: > { %s29_s27 = sadd.s32 1, %s682_s25  ;;  %p626_p0 = scmp.ge.s32.totalorder %s686_s26, 1  ;;  %s686_s26 = sphi %s732_s26, %s17_s26   ;;  %s682_s25 = sphi %s730_s25, %s892_s25   ;;  %s678_s24 = sphi %s728_s24, %s891_s24  }
   0x3   : > { %p31_p1 = scmp.ge.s32.totalorder %s29_s27, 2  ;;  %p276_p2 = scmp.lt.s32.totalorder %s686_s26, 3 }
   0x5   : > { %s894_s27 = smov (%p31_p1, %s29_s27), 0  ;;  %p277_p3 = pnand %p626_p0, %p276_p2 }
   0x6   : > { %p318_p4 = scmp.lt.s32.totalorder (!%p277_p3), %s678_s24, 1 }
   0x7   : > { %280 = sbr.rel (%p277_p3) target bundleno = 482 (0x1e2), region = 48 }
   0xc   : > { %s896_s24 = smov (!%p318_p4, %s678_s24), 1  ;;  %v395_v2 = vld [vmem:[%s886_s3 + $0x78] sm:$0xff]  ;;  %v394_v3 = vld [vmem:[%s886_s3 + $0x70] sm:$0xff]  ;;  %v393_v4 = vld [vmem:[%s886_s3 + $0x68] sm:$0xff] }
   0xd   : > { %s627_s28 = sshll.u32 %s896_s24, 3  ;;  %400 = vmatpush.msra.mxu0 %v395_v2  ;;  %v392_v5 = vld [vmem:[%s886_s3 + $0x60] sm:$0xff]  ;;  %v391_v6 = vld [vmem:[%s886_s3 + $0x58] sm:$0xff]  ;;  %v390_v7 = vld [vmem:[%s886_s3 + $0x50] sm:$0xff] }
   0xe   : > { %s321_s8 = scalar_lea.vmem %s883_s0, %s627_s28  ;;  %v389_v8 = vld [vmem:[%s886_s3 + $0x48] sm:$0xff]  ;;  %v388_v9 = vld [vmem:[%s886_s3 + $0x40] sm:$0xff]  ;;  %v387_v10 = vld [vmem:[%s886_s3 + $0x38] sm:$0xff]  ;;  %s338_s11 = scalar_lea.vmem %s890_s7, %s627_s28 }
   0xf   : > { %v754_v0 = vld [vmem:[%s321_s8] sm:$0xff]  ;;  %401 = vmatpush.msra.mxu0 %v394_v3  ;;  %v386_v11 = vld [vmem:[%s886_s3 + $0x30] sm:$0xff]  ;;  %v385_v12 = vld [vmem:[%s886_s3 + $0x28] sm:$0xff] }
  0x10   : > { %344 = vadd.xlane.f32.xlu0 %v754_v0  ;;  %v347_v1 = vmul.f32 %v754_v0, %v754_v0  ;;  %v384_v13 = vld [vmem:[%s886_s3 + $0x20] sm:$0xff]  ;;  %v383_v14 = vld [vmem:[%s886_s3 + $0x18] sm:$0xff]  ;;  %v382_v16 = vld [vmem:[%s886_s3 + $0x10] sm:$0xff] }
  0x11   : > { %402 = vmatpush.msra.mxu0 %v393_v4  ;;  %v381_v17 = vld [vmem:[%s886_s3 + $0x8] sm:$0xff]  ;;  %v380_v19 = vld [vmem:[%s886_s3] sm:$0xff]  ;;  %v480_v39 = vld [vmem:[%s888_s5 + $0x78] sm:$0xff] }
  0x12   : > { %v656_v33 = vld [vmem:[%s884_s1] ss:$0 sm:$0xff]  ;;  %481 = vmatpush.msra.mxu1 %v480_v39  ;;  %v479_v40 = vld [vmem:[%s888_s5 + $0x70] sm:$0xff]  ;;  %v478_v41 = vld [vmem:[%s888_s5 + $0x68] sm:$0xff] }
  0x13   : > { %403 = vmatpush.msra.mxu0 %v392_v5  ;;  %v657_v36 = vld [vmem:[%s885_s2] ss:$0 sm:$0xff]  ;;  %v476_v44 = vld [vmem:[%s888_s5 + $0x58] sm:$0xff]  ;;  %v475_v45 = vld [vmem:[%s888_s5 + $0x50] sm:$0xff] }
  0x14   : > { %482 = vmatpush.msra.mxu1 %v479_v40  ;;  %v477_v42 = vld [vmem:[%s888_s5 + $0x60] sm:$0xff]  ;;  %v474_v47 = vld [vmem:[%s888_s5 + $0x48] sm:$0xff]  ;;  %v472_v51 = vld [vmem:[%s888_s5 + $0x38] sm:$0xff] }
  0x15   : > { %404 = vmatpush.msra.mxu0 %v391_v6  ;;  %v658_v43 = vld [vmem:[%s887_s4] ss:$0 sm:$0xff]  ;;  %v471_v53 = vld [vmem:[%s888_s5 + $0x30] sm:$0xff]  ;;  %v470_v55 = vld [vmem:[%s888_s5 + $0x28] sm:$0xff] }
  0x16   : > { %483 = vmatpush.msra.mxu1 %v478_v41  ;;  %v473_v49 = vld [vmem:[%s888_s5 + $0x40] sm:$0xff]  ;;  %v468_v61 = vld [vmem:[%s888_s5 + $0x18] sm:$0xff]  ;;  %v466_v4 = vld [vmem:[%s888_s5 + $0x8] sm:$0xff] }
  0x17   : > { %405 = vmatpush.msra.mxu0 %v390_v7  ;;  %v469_v58 = vld [vmem:[%s888_s5 + $0x20] sm:$0xff] }
  0x18   : > { %348 = vadd.xlane.f32.xlu0 %v347_v1  ;;  %484 = vmatpush.msra.mxu1 %v477_v42  ;;  %v467_v1 = vld [vmem:[%s888_s5 + $0x10] sm:$0xff]  ;;  %v465_v6 = vld [vmem:[%s888_s5] sm:$0xff] }
  0x19   : > { %406 = vmatpush.msra.mxu0 %v389_v8 }
  0x1a   : > { %485 = vmatpush.msra.mxu1 %v476_v44 }
  0x1b   : > { %407 = vmatpush.msra.mxu0 %v388_v9 }
  0x1c   : > { %486 = vmatpush.msra.mxu1 %v475_v45 }
  0x1d   : > { %408 = vmatpush.msra.mxu0 %v387_v10 }
  0x1e   : > { %487 = vmatpush.msra.mxu1 %v474_v47 }
  0x1f   : > { %409 = vmatpush.msra.mxu0 %v386_v11 }
  0x20   : > { %488 = vmatpush.msra.mxu1 %v473_v49 }
  0x21   : > { %410 = vmatpush.msra.mxu0 %v385_v12 }
  0x22   : > { %489 = vmatpush.msra.mxu1 %v472_v51 }
  0x23   : > { %411 = vmatpush.msra.mxu0 %v384_v13 }
  0x24   : > { %490 = vmatpush.msra.mxu1 %v471_v53 }
  0x25   : > { %412 = vmatpush.msra.mxu0 %v383_v14 }
  0x26   : > { %491 = vmatpush.msra.mxu1 %v470_v55 }
  0x27   : > { %413 = vmatpush.msra.mxu0 %v382_v16 }
  0x28   : > { %492 = vmatpush.msra.mxu1 %v469_v58 }
  0x29   : > { %414 = vmatpush.msra.mxu0 %v381_v17 }
  0x2a   : > { %493 = vmatpush.msra.mxu1 %v468_v61 }
  0x2b   : > { %415 = vmatpush.msra.mxu0 %v380_v19 }
  0x2c   : > { %494 = vmatpush.msra.mxu1 %v467_v1 }
  0x2e   : > { %495 = vmatpush.msra.mxu1 %v466_v4 }
  0x30   : > { %496 = vmatpush.msra.mxu1 %v465_v6 }
  0x83   : > { %v345_v15 = vpop.xlane.xlu0 %344 }
  0x84   : > { %v346_v18 = vmul.f32 0.03125, %v345_v15 }
  0x86   : > { %v351_v21 = vmul.f32 %v346_v18, %v346_v18  ;;  %v365_v32 = vsub.f32 %v754_v0, %v346_v18 }
  0x8b   : > { %v349_v20 = vpop.xlane.xlu0 %348 }
  0x8c   : > { %v350_v22 = vmul.f32 0.03125, %v349_v20 }
  0x8e   : > { %v352_v23 = vsub.f32 %v350_v22, %v351_v21 }
  0x90   : > { %v353_v24 = vmax.f32 %v352_v23, 0.0 }
  0x92   : > { %v354_v25 = vadd.f32 1e-05, %v353_v24 }
  0x94   : > { %660 = vrsqrt.f32 %v354_v25  ;;  %vm361_vm1 = vweird.f32 %v354_v25 }
  0x9a   : > { %v661_v26 = vpop.eup %660 }
  0x9b   : > { %v356_v27 = vmul.f32 %v661_v26, %v354_v25  ;;  %vm362_vm0 = vweird.f32 %v661_v26 }
  0x9c   : > { %vm363_vm2 = vmor %vm361_vm1, %vm362_vm0 }
  0x9d   : > { %v357_v28 = vmul.f32 %v661_v26, %v356_v27 }
  0x9f   : > { %v358_v29 = vmul.f32 0.5, %v357_v28 }
  0xa1   : > { %v359_v30 = vsub.f32 1.5, %v358_v29 }
  0xa3   : > { %v360_v31 = vmul.f32 %v661_v26, %v359_v30 }
  0xa5   : > { %v364_v34 = vsel %vm363_vm2, %v661_v26, %v360_v31 }
  0xa6   : > { %v366_v35 = vmul.f32 %v365_v32, %v364_v34  ;;  %v659_v34 = vld [vmem:[%s889_s6] ss:$0 sm:$0xff] }
  0xa8   : > { %v371_v37 = vmul.f32 %v656_v33, %v366_v35 }
  0xaa   : > { %v376_v38 = vadd.f32 %v657_v36, %v371_v37 }
  0xac   : > { %416 = vmatmul.f32.vlgmr.msra.gmra.mxu0 %v376_v38 }
 0x129   : > { %v417_v46 = vpop.f32.mrf.mxu0 }
 0x12a   : > { %v418_v48 = vadd.f32 %v658_v43, %v417_v46 }
 0x12c   : > { %v421_v50 = vmul.f32 0.70710677, %v418_v48  ;;  %v420_v31 = vmul.f32 0.5, %v418_v48 }
 0x12e   : > { %v422_v52 = vmul.f32 %v421_v50, %v421_v50 }
 0x130   : > { %v423_v54 = vmin.f32 %v422_v52, 16.0 }
 0x132   : > { %v424_v56 = vmul.f32 2.1237322e-06, %v423_v54  ;;  %v435_v57 = vmul.f32 3.8918573e-05, %v423_v54 }
 0x134   : > { %v425_v59 = vadd.f32 0.00028619796, %v424_v56  ;;  %v436_v60 = vadd.f32 0.001143296, %v435_v57 }
 0x136   : > { %v426_v62 = vmul.f32 %v425_v59, %v423_v54  ;;  %v437_v63 = vmul.f32 %v436_v60, %v423_v54 }
 0x138   : > { %v438_v2 = vadd.f32 0.014752088, %v437_v63  ;;  %v427_v3 = vadd.f32 0.0036580483, %v426_v62 }
 0x13a   : > { %v439_v5 = vmul.f32 %v438_v2, %v423_v54  ;;  %v428_v8 = vmul.f32 %v427_v3, %v423_v54 }
 0x13c   : > { %v440_v7 = vadd.f32 0.112945676, %v439_v5  ;;  %v429_v11 = vadd.f32 0.05243302, %v428_v8 }
 0x13e   : > { %v441_v9 = vmul.f32 %v440_v7, %v423_v54  ;;  %v430_v14 = vmul.f32 %v429_v11, %v423_v54 }
 0x140   : > { %v442_v10 = vadd.f32 0.4994258, %v441_v9  ;;  %v431_v15 = vadd.f32 0.18741608, %v430_v14 }
 0x142   : > { %v443_v12 = vmul.f32 %v442_v10, %v423_v54  ;;  %v432_v17 = vmul.f32 %v431_v15, %v423_v54 }
 0x144   : > { %v444_v13 = vadd.f32 1.0, %v443_v12  ;;  %v433_v21 = vadd.f32 1.1283791, %v432_v17 }
 0x146   : > { %662 = vrcp.f32 %v444_v13  ;;  %v456_v20 = vand.u32 2147483648, %v444_v13  ;;  %v454_v23 = vand.u32 2147483647, %v444_v13  ;;  %vm450_vm4 = vweird.f32 %v444_v13 }
 0x147   : > { %v434_v26 = vmul.f32 %v433_v21, %v421_v50 }
 0x148   : > { %v457_v25 = vor.u32 1.1754944e-38, %v456_v20  ;;  %vm455_vm6 = vcmp.eq.f32.partialorder %v454_v23, 8.507059e+37 }
 0x14c   : > { %v663_v16 = vpop.eup %662 }
 0x14d   : > { %v446_v18 = vmul.f32 %v663_v16, %v444_v13  ;;  %vm451_vm3 = vweird.f32 %v663_v16 }
 0x14e   : > { %vm452_vm5 = vmor %vm450_vm4, %vm451_vm3 }
 0x14f   : > { %v447_v19 = vsub.f32 1.0, %v446_v18 }
 0x151   : > { %v448_v22 = vmul.f32 %v663_v16, %v447_v19 }
 0x153   : > { %v449_v24 = vadd.f32 %v663_v16, %v448_v22 }
 0x155   : > { %v453_v27 = vsel %vm452_vm5, %v663_v16, %v449_v24 }
 0x156   : > { %v458_v28 = vsel %vm455_vm6, %v457_v25, %v453_v27 }
 0x157   : > { %v459_v29 = vmul.f32 %v458_v28, %v434_v26 }
 0x159   : > { %v629_v30 = vclamps-f32 %v459_v29, 1.0 }
 0x15b   : > { %v462_v32 = vadd.f32 1.0, %v629_v30 }
 0x15d   : > { %v463_v33 = vmul.f32 %v462_v32, %v420_v31 }
 0x15f   : > { %497 = vmatmul.f32.vlgmr.msra.gmra.mxu1 %v463_v33 }
 0x1dc   : > { %v498_v35 = vpop.f32.mrf.mxu1 }
 0x1dd   : > { %v511_v36 = vadd.f32 %v659_v34, %v498_v35 }
 0x1df   : > { %v513_v37 = vadd.f32 %v511_v36, %v754_v0 }
 0x1e1   : > { %514 = vst [vmem:[%s338_s11] sm:$0xff] %v513_v37 }
 0x1e2 PF: > { %s17_s26 = sadd.s32 1, %s686_s26   ;;  %s891_s24 = smov %s682_s25 }
 0x1e3   : > { %p14_p5 = scmp.ge.s32.totalorder %s17_s26, 4   ;;  %s892_s25 = smov %s894_s27 }
 0x1e5   :  { %16 = sbr.rel (!%p14_p5) target bundleno = 2 (0x2), region = 95 }

</bundles_post_ra>
